<compile_context>
chip_gen: v6e
topology: v6e:2x2x1
jax: 0.10.0
libtpu: 0.0.40
codegen_flags: <defaults>
</compile_context>

<pallas_src>
import functools

import jax
import jax.numpy as jnp
from jax.experimental import pallas as pl
from jax.experimental.pallas import tpu as pltpu


def _round_up(x, m):
    return ((x + m - 1) // m) * m


def _pick_col_block(z_total, max_cols=2048):
    """Largest multiple of 128 that divides z_total and is <= max_cols."""
    best = 128
    c = 128
    limit = min(z_total, max_cols)
    while c <= limit:
        if z_total % c == 0:
            best = c
        c += 128
    return best


def _split_kernel(mu_in_ref, sg_in_ref, mu_ref, sigma_ref):
    # Lane-aligned halves delivered by BlockSpec DMA: no in-kernel column
    # slicing, one tanh pass + one exp pass (EUP), lane-dense stores.
    mu_ref[...] = jnp.tanh(mu_in_ref[...])
    sigma_ref[...] = jnp.exp(sg_in_ref[...])


def _fused_kernel(a_ref, out_ref, *, z_total):
    # z_total not a multiple of 128: compute both activations over the whole
    # (tm, 2Z) tile and select per column, so the single store is as
    # lane-dense as the input allows.  The redundant EUP work is hidden
    # (this kernel is HBM-bound; the EUP slot has slack).
    a = a_ref[...]
    col = jax.lax.broadcasted_iota(jnp.int32, a.shape, dimension=1)
    out_ref[...] = jnp.where(col < z_total, jnp.tanh(a), jnp.exp(a))


def inference_model_no_hidden(hidden, adaptive_vars=None, *, z_dim,
                              force_pallas=False):
    """hidden: (B, h_dim); adaptive_vars: (B, 2*sum(z_dim)) or None.

    Returns [mu_inference, sigma_inference], each (B, sum(z_dim)).
    """
    batch = hidden.shape[0]
    z_total = int(sum(z_dim))

    if adaptive_vars is None:
        # Constant NaN fill: no compute, plain XLA constant.
        nan = jnp.full((batch, z_total), jnp.nan, dtype=hidden.dtype)
        return [nan, nan]
    if not hasattr(adaptive_vars, "shape"):
        raise Exception("Error.")

    B, two_z = adaptive_vars.shape
    assert two_z == 2 * z_total, "adaptive_vars must have 2*sum(z_dim) columns"

    out_dtype = adaptive_vars.dtype
    itemsize = jnp.dtype(out_dtype).itemsize
    total_bytes = B * two_z * itemsize

    # Tiny inputs: custom-call dispatch + per-step overhead dominates; XLA
    # fuses the two elementwise ops and wins.
    if not force_pallas and total_bytes < (256 << 10):
        return [jnp.tanh(adaptive_vars[:, :z_total]),
                jnp.exp(adaptive_vars[:, z_total:])]

    sub = max(8, 32 // itemsize)            # sublane multiple for this dtype
    lane_aligned = (z_total % 128 == 0)

    if lane_aligned:
        tz = _pick_col_block(z_total)       # column block per half
        col_steps = z_total // tz
        cols_per_step = tz
    else:
        tz = z_total
        col_steps = 1
        cols_per_step = z_total

    # Byte-based row tile: ~4 MiB of in+out traffic per grid step
    # (2 input halves + 2 output halves, or fused 2Z in + 2Z out).
    per_row_bytes = 4 * cols_per_step * itemsize
    target_step_bytes = 4 << 20
    tm = max(sub, target_step_bytes // per_row_bytes)
    if tm >= B:
        tm = B
    else:
        tm = max(sub, (tm // sub) * sub)

    # Guarantee >= 2 grid steps when the batch allows it: shards across v7x's
    # two TensorCores and gives the software pipeline something to prefetch.
    if pl.cdiv(B, tm) * col_steps < 2 and B >= 2 * sub:
        tm = max(sub, _round_up(pl.cdiv(B, 2), sub))

    row_steps = pl.cdiv(B, tm)
    step_bytes = 4 * cols_per_step * itemsize * tm
    # Double-buffered tiles need ~2*step_bytes; keep headroom, stay under the
    # 64 MiB physical VMEM of a v7x TensorCore.
    vmem_limit = int(min(48 << 20, max(32 << 20, 4 * step_bytes)))

    cost = pl.CostEstimate(
        flops=2 * B * z_total,                                    # selects/casts, negligible
        transcendentals=2 * B * (z_total if lane_aligned else 2 * z_total),
        bytes_accessed=4 * B * z_total * itemsize,                # read 2Z + write 2Z per row
    )
    cparams = pltpu.CompilerParams(
        dimension_semantics=("parallel",) * (2 if lane_aligned else 1),
        vmem_limit_bytes=vmem_limit,
    )

    if lane_aligned:
        ncol = col_steps
        mu, sigma = pl.pallas_call(
            _split_kernel,
            out_shape=(
                jax.ShapeDtypeStruct((B, z_total), out_dtype),
                jax.ShapeDtypeStruct((B, z_total), out_dtype),
            ),
            grid=(row_steps, col_steps),
            in_specs=[
                # tanh half and exp half of the same array, DMA'd separately
                # so the kernel never slices columns in VMEM.
                pl.BlockSpec((tm, tz), lambda i, j: (i, j)),
                pl.BlockSpec((tm, tz), lambda i, j, ncol=ncol: (i, j + ncol)),
            ],
            out_specs=(
                pl.BlockSpec((tm, tz), lambda i, j: (i, j)),
                pl.BlockSpec((tm, tz), lambda i, j: (i, j)),
            ),
            compiler_params=cparams,
            cost_estimate=cost,
        )(adaptive_vars, adaptive_vars)
        return [mu, sigma]

    kernel = functools.partial(_fused_kernel, z_total=z_total)
    fused = pl.pallas_call(
        kernel,
        out_shape=jax.ShapeDtypeStruct((B, 2 * z_total), out_dtype),
        grid=(row_steps,),
        in_specs=[pl.BlockSpec((tm, 2 * z_total), lambda i: (i, 0))],
        out_specs=pl.BlockSpec((tm, 2 * z_total), lambda i: (i, 0)),
        compiler_params=cparams,
        cost_estimate=cost,
    )(adaptive_vars)
    # Split of the fused lane-dense output happens in plain XLA.
    return [fused[:, :z_total], fused[:, z_total:]]


if __name__ == "__main__":
    key = jax.random.PRNGKey(0)
    k1, k2, k3, k4 = jax.random.split(key, 4)

    # ---- Case 1: small, z_total NOT lane-aligned -> fused-output kernel ----
    batch, h_dim = 8, 32
    z_dim = (8, 8, 16)                       # sum(z_dim) = 32
    z_total = sum(z_dim)
    hidden = jax.random.normal(k1, (batch, h_dim), dtype=jnp.float32)
    av = jax.random.normal(k2, (batch, 2 * z_total), dtype=jnp.float32)

    mu, sigma = inference_model_no_hidden(hidden, av, z_dim=z_dim,
                                          force_pallas=True)
    mu = jax.block_until_ready(mu)
    sigma = jax.block_until_ready(sigma)
    assert mu.shape == (batch, z_total) and sigma.shape == (batch, z_total)
    assert jnp.allclose(mu, jnp.tanh(av[:, :z_total]), atol=1e-5, rtol=1e-5)
    assert jnp.allclose(sigma, jnp.exp(av[:, z_total:]), atol=1e-5, rtol=1e-5)

    # ---- Case 2: lane-aligned z_total -> split kernel, >= 2 grid steps ----
    batch2 = 32
    z_dim2 = (64, 64)                        # sum(z_dim) = 128
    z_total2 = sum(z_dim2)
    hidden2 = jax.random.normal(k3, (batch2, 16), dtype=jnp.float32)
    av2 = jax.random.normal(k4, (batch2, 2 * z_total2), dtype=jnp.float32)

    mu2, sigma2 = inference_model_no_hidden(hidden2, av2, z_dim=z_dim2,
                                            force_pallas=True)
    mu2 = jax.block_until_ready(mu2)
    sigma2 = jax.block_until_ready(sigma2)
    assert jnp.allclose(mu2, jnp.tanh(av2[:, :z_total2]), atol=1e-5, rtol=1e-5)
    assert jnp.allclose(sigma2, jnp.exp(av2[:, z_total2:]), atol=1e-5, rtol=1e-5)

    # ---- Case 3: tiny-input fallback (plain XLA path) ----
    mu3, sigma3 = inference_model_no_hidden(hidden, av, z_dim=z_dim)
    mu3 = jax.block_until_ready(mu3)
    assert jnp.allclose(mu3, jnp.tanh(av[:, :z_total]), atol=1e-5, rtol=1e-5)

    # ---- Case 4: adaptive_vars=None -> NaN-filled params ----
    mu_nan, sigma_nan = inference_model_no_hidden(hidden, None, z_dim=z_dim)
    mu_nan = jax.block_until_ready(mu_nan)
    sigma_nan = jax.block_until_ready(sigma_nan)
    assert mu_nan.shape == (batch, z_total)
    assert sigma_nan.shape == (batch, z_total)
    assert bool(jnp.all(jnp.isnan(mu_nan)))
    assert bool(jnp.all(jnp.isnan(sigma_nan)))

    print("KERNEL_OK")
</pallas_src>

<mosaic_0001>
module attributes {stable_mosaic.version = 11 : i64} {
  func.func @_fused_kernel(%arg0: i32, %arg1: memref<8x64xf32, #tpu.memory_space<vmem>>, %arg2: memref<8x64xf32, #tpu.memory_space<vmem>>) attributes {dimension_semantics = [#tpu.dimension_semantics<parallel>], iteration_bounds = array<i64: 1>, scalar_prefetch = 0 : i64, scratch_operands = 0 : i64, tpu.core_type = #tpu.core_type<tc>, window_params = [{transform_indices = @transform_0, window_bounds = array<i64: 8, 64>}, {transform_indices = @transform_1, window_bounds = array<i64: 8, 64>}]} {
    %c0 = arith.constant 0 : index
    %c0_0 = arith.constant 0 : index
    %0 = vector.load %arg1[%c0, %c0_0] : memref<8x64xf32, #tpu.memory_space<vmem>>, vector<8x64xf32>
    %1 = tpu.iota {dimensions = array<i32: 1>} : vector<8x64xi32>
    %c32_i32 = arith.constant 32 : i32
    %2 = vector.broadcast %c32_i32 : i32 to vector<8x64xi32>
    %3 = arith.cmpi slt, %1, %2 : vector<8x64xi32>
    %4 = math.tanh %0 : vector<8x64xf32>
    %5 = math.exp %0 : vector<8x64xf32>
    %6 = arith.select %3, %4, %5 : vector<8x64xi1>, vector<8x64xf32>
    %c0_1 = arith.constant 0 : index
    %c0_2 = arith.constant 0 : index
    %7 = vector.load %arg2[%c0_1, %c0_2] : memref<8x64xf32, #tpu.memory_space<vmem>>, vector<8x64xf32>
    tpu.vector_store %arg2[%c0_1, %c0_2], %6 {strides = array<i32>} : memref<8x64xf32, #tpu.memory_space<vmem>>, vector<8x64xf32>,
    return
  }
  func.func @transform_0(%arg0: i32) -> (i32, i32) {
    %c0_i32 = arith.constant 0 : i32
    %c0_i32_0 = arith.constant 0 : i32
    return %arg0, %c0_i32 : i32, i32
  }
  func.func @transform_1(%arg0: i32) -> (i32, i32) {
    %c0_i32 = arith.constant 0 : i32
    %c0_i32_0 = arith.constant 0 : i32
    return %arg0, %c0_i32 : i32, i32
  }
}

</mosaic_0001>

<bundles_post_ra>
// kernel: tpu_custom_call.1
= control target key start
LH: loop header
LB: loop body
LE: loop exit
PB: predicated region body
PF: predicated region fallthrough
CT: control target
= control target key end

     0   :  { %6 = vsyncpa [#allocation3], 0  ;;  %s114_s0 = inlined_call_operand.hbm [shape: f32[8,64], index: 0, kind: input, shape index: {}]   ;;  %s115_s1 = inlined_call_operand.hbm [shape: f32[8,64], index: 1, kind: output, shape index: {}]  }
   0x1   :  { %7 = vsyncpa [#allocation4], 0  ;;  %s96_s6 = smov [#allocation2]  }
   0x2   :  { %s14_s7 = sshll.u32 %s96_s6, 4  ;;  %s15_s7 = int_to_ptr.vmem [resolvable:$true] %s14_s7 }
   0x3   :  { %s60_s8 = scalar_lea.vmem %s15_s7, 128  ;;  %p65_p1 = scmp.lt.s32.totalorder %s15_s7, %s15_s7 }
   0x4   :  { %p61_p0 = scmp.ne.s32.totalorder %s15_s7, %s60_s8  ;;  %p66_p2 = scmp.lt.s32.totalorder %s60_s8, %s60_s8 }
   0x6   :  { %p67_p3 = por %p66_p2, %p65_p1 }
   0x8   :  { %p68_p4 = pnand %p67_p3, %p61_p0 }
   0xa   :  { %71 = shalt.err (!%p68_p4)
}
   0xb   :  { %17 = dma.hbm_to_vmem [thread:$0]  %s114_s0, 128, %s15_s7, [#allocation3]  }
   0xc   :  { %92 = dma.done.wait [#allocation3], 128  }
   0xd   :  { %93 = vsyncadd [#allocation3], 4294967168  ;;  %v21_v0 = vld [vmem:[#allocation2] sm:$0xff]  ;;  %v22_v2 = vlaneseq  ;;  %s97_s11 = smov [#allocation5]   ;;  %vm29_vm1 = vcmask 523264  }
   0xe   :  { %48 = vtanh.f32 %v21_v0  ;;  %v26_v1 = vmul.f32 1.442695, %v21_v0  ;;  %s37_s12 = sshll.u32 %s97_s11, 4  ;;  %s38_s12 = int_to_ptr.vmem [resolvable:$true] %s37_s12 }
   0xf   :  { %v23_v3 = vand.u32 127, %v22_v2  ;;  %s72_s13 = scalar_lea.vmem %s38_s12, 128  ;;  %p77_p6 = scmp.lt.s32.totalorder %s38_s12, %s38_s12 }
  0x10   :  { %50 = vpow2.f32 %v26_v1  ;;  %p73_p5 = scmp.ne.s32.totalorder %s38_s12, %s72_s13  ;;  %p78_p7 = scmp.lt.s32.totalorder %s72_s13, %s72_s13 }
  0x11   :  { %vm24_vm0 = vcmp.lt.s32.totalorder %v23_v3, 32 }
  0x12   :  { %p79_p8 = por %p78_p7, %p77_p6 }
  0x14   :  { %p80_p9 = pnand %p79_p8, %p73_p5 }
  0x1b   :  { %v49_v4 = vpop.eup %48 }
  0x1d   :  { %v51_v5 = vpop.eup %50 }
  0x1e   :  { %v28_v6 = vsel %vm24_vm0, %v49_v4, %v51_v5 }
  0x1f   :  { %30 = vst.msk [vmem:[#allocation5] sm:$0xff] %vm29_vm1, %v28_v6 }
  0x20   :  { %83 = shalt.err (!%p80_p9)
}
  0x21   :  { %40 = dma.vmem_to_hbm [thread:$0]  %s38_s12, 128, %s115_s1, [#allocation4]  }
  0x22   :  { %94 = dma.done.wait [#allocation4], 128  }
  0x23   :  { %95 = vsyncadd [#allocation4], 4294967168 }
  0x24   :  { %44 = vsyncpa [#allocation3], 1 }
  0x25   :  { %45 = vsyncpa [#allocation4], 1 }

</bundles_post_ra>
